<compile_context>
chip_gen: v7x
topology: tpu7x:2x2x1
jax: 0.10.0
libtpu: 0.0.40
codegen_flags: <defaults>
</compile_context>

<pallas_src>
import functools
import math

import jax
import jax.numpy as jnp
from jax.experimental import pallas as pl
from jax.experimental.pallas import tpu as pltpu

_LANE = 128
_SUBLANE = 8


def _round_up(v, m):
    return -(-v // m) * m


def _round_down(v, m):
    return (v // m) * m


# ----------------------------------------------------------------------------- kernels


def _block_argmax(x, axis, kk, *, k_total, k_tile, mask_tail, neg_fill):
    """(max, first-argmax) of a rank-2 block along `axis`, with *global* k indices.

    NaN handling matches torch.argmax / jnp.argmax: NaN acts as the maximum.  If the
    block holds a NaN, `mx` is NaN, `x == mx` is all-False and `isnan(x)` selects the
    (first) NaN position instead.
    """
    if mask_tail:
        # Tail k-block: neutralize the rows/lanes past the true extent K.
        local = jax.lax.broadcasted_iota(jnp.int32, x.shape, axis)
        x = jnp.where(local < (k_total - kk * k_tile), x, jnp.asarray(neg_fill, x.dtype))
    mx = jnp.max(x, axis=axis, keepdims=True)
    hit = (x == mx) | jnp.isnan(x)
    gidx = jax.lax.broadcasted_iota(jnp.int32, x.shape, axis) + kk * k_tile
    bidx = jnp.min(jnp.where(hit, gidx, jnp.int32(k_total)), axis=axis, keepdims=True)
    return mx, bidx


def _merge(kk, mx, bidx, m_prev, i_prev):
    """Merge a block result into the running (max, first-index) carried across k."""
    # Strict > keeps the earlier (smaller) index on ties; a NaN in the new block only
    # wins if the running max is not already NaN (the earlier NaN has the smaller
    # index).  kk == 0 overrides the (uninitialized) carried state.
    take_new = (kk == 0) | (mx > m_prev) | (jnp.isnan(mx) & ~jnp.isnan(m_prev))
    return jnp.where(take_new, mx, m_prev), jnp.where(take_new, bidx, i_prev)


def _argmax_kernel_sublane(x_ref, o_ref, m_ref, *, k_total, k_tile, mask_tail, neg_fill):
    # Reduced dim on sublanes.  x_ref: (1, KT, T); o_ref: (1, 1, T); m_ref: (1, T).
    kk = pl.program_id(2)
    mx, bidx = _block_argmax(x_ref[0], 0, kk, k_total=k_total, k_tile=k_tile,
                             mask_tail=mask_tail, neg_fill=neg_fill)
    m_new, i_new = _merge(kk, mx, bidx, m_ref[...], o_ref[0])
    m_ref[...] = m_new
    o_ref[0] = i_new


def _argmax_kernel_lane(x_ref, o_ref, m_ref, *, k_total, k_tile, mask_tail, neg_fill):
    # Reduced dim on lanes (last-axis argmax).  x_ref: (OB, KT); o_ref/m_ref: (OB, 1).
    kk = pl.program_id(2)
    mx, bidx = _block_argmax(x_ref[...], 1, kk, k_total=k_total, k_tile=k_tile,
                             mask_tail=mask_tail, neg_fill=neg_fill)
    m_new, i_new = _merge(kk, mx, bidx, m_ref[...], o_ref[...])
    m_ref[...] = m_new
    o_ref[...] = i_new


# ----------------------------------------------------------------------------- wrapper


def _vmem_budget(itemsize, block_elems_override):
    """Per-step x-block element budget (generation- and dtype-aware) + VMEM capacity."""
    try:
        info = pltpu.get_tpu_info()
        cap = int(getattr(info, "vmem_capacity_bytes", 0)) or (128 << 20)
    except Exception:  # pragma: no cover - conservative fallback off-TPU / API drift
        cap = 128 << 20
    # Working set of one grid step = double-buffered input block + the int32 iota /
    # candidate-index temporaries (+ masked copy).  Smaller target on v7x (64 MiB VMEM).
    work_target = (24 << 20) if cap >= (96 << 20) else (18 << 20)
    per_elem = 3 * itemsize + 8
    elem_budget = max(_SUBLANE * _LANE, work_target // per_elem)
    if block_elems_override is not None:
        elem_budget = max(_SUBLANE * _LANE, int(block_elems_override))
    return elem_budget, cap


def argmax_forward(x, dim=None, *, block_elems=None):
    """Pallas TPU equivalent of torch.argmax(x, dim=dim).

    Returns int32 indices with dimension `dim` removed (torch returns int64; int32 is
    used here and guarded for K < 2**31).  `block_elems` is a test-only override of
    the per-block element budget.
    """
    if dim is None:
        # TODO(synk): dim=None (global argmax over the flattened tensor) needs a
        # lane-friendly 2D re-tiling of the flat vector; not implemented here.
        raise NotImplementedError("ArgMax with dim=None is not implemented")

    ndim = x.ndim
    if dim < 0:
        dim += ndim
    if not 0 <= dim < ndim:
        raise ValueError(f"dim out of range: {dim} for rank {ndim}")

    shape = x.shape
    outer = math.prod(shape[:dim]) if dim > 0 else 1
    k = shape[dim]
    inner = math.prod(shape[dim + 1:]) if dim < ndim - 1 else 1
    if k <= 0:
        raise ValueError("argmax over an empty dimension")
    if k >= 2 ** 31:
        raise ValueError("reduced dimension too large for int32 indices")

    itemsize = jnp.dtype(x.dtype).itemsize
    elem_budget, vmem_cap = _vmem_budget(itemsize, block_elems)

    if jnp.issubdtype(x.dtype, jnp.floating):
        neg_fill = float("-inf")
    else:
        neg_fill = int(jnp.iinfo(x.dtype).min)

    out_final_shape = shape[:dim] + shape[dim + 1:]

    if inner > 1:
        # ---- reduced dim on sublanes, `inner` on lanes (free contiguous reshape) ----
        x_v = x.reshape(outer, k, inner)
        if inner <= 1024:
            t_tile = inner  # full extent: always a legal block dim, lane-dense if >=128
        else:
            # 1024+ lane tiles give >=2-4 KiB DMA rows and lane-dense stores; grow
            # further only when K is small so per-step bytes stay reasonable.
            t_tile = min(_round_down(inner, _LANE),
                         max(1024, _round_down(elem_budget // _round_up(k, _SUBLANE),
                                               _LANE)),
                         4096)
        slab_elems = _round_up(k, _SUBLANE) * _round_up(t_tile, _LANE)
        if slab_elems <= elem_budget:
            k_tile = k
        else:
            # Split-K: reduced dim tiled on the last ("arbitrary") grid axis; merged via
            # the running (max, index) carried in the resident output block + scratch.
            k_tile = max(_SUBLANE,
                         _round_down(elem_budget // _round_up(t_tile, _LANE), _SUBLANE))
            k_tile = min(k_tile, k)
        k_blocks = pl.cdiv(k, k_tile)
        mask_tail = (k % k_tile) != 0
        grid = (outer, pl.cdiv(inner, t_tile), k_blocks)

        in_spec = pl.BlockSpec((1, k_tile, t_tile), lambda b, t, kk: (b, kk, t))
        out_spec = pl.BlockSpec((1, 1, t_tile), lambda b, t, kk: (b, 0, t))
        out_struct = jax.ShapeDtypeStruct((outer, 1, inner), jnp.int32)
        scratch = pltpu.VMEM((1, t_tile), x.dtype)
        kernel = functools.partial(_argmax_kernel_sublane, k_total=k, k_tile=k_tile,
                                   mask_tail=mask_tail, neg_fill=neg_fill)
        x_block_elems = _round_up(k_tile, _SUBLANE) * _round_up(t_tile, _LANE)
        o_block_elems = _SUBLANE * _round_up(t_tile, _LANE)
    else:
        # ---- last-axis argmax: reduced dim on lanes, `outer` rows on sublanes ----
        x_v = x.reshape(outer, k)
        row_elems = _round_up(k, _LANE)
        if row_elems * _SUBLANE <= elem_budget:
            k_tile = k
            ob = min(outer, max(_SUBLANE, elem_budget // row_elems))
        else:
            ob = min(outer, 256)
            k_tile = max(_LANE,
                         _round_down(elem_budget // max(_round_up(ob, _SUBLANE), _SUBLANE),
                                     _LANE))
            k_tile = min(k_tile, k)
        if outer >= _SUBLANE:
            ob = max(_SUBLANE, _round_down(min(ob, outer), _SUBLANE))
        else:
            ob = outer
        k_blocks = pl.cdiv(k, k_tile)
        mask_tail = (k % k_tile) != 0
        grid = (pl.cdiv(outer, ob), 1, k_blocks)

        in_spec = pl.BlockSpec((ob, k_tile), lambda b, t, kk: (b, kk))
        out_spec = pl.BlockSpec((ob, 1), lambda b, t, kk: (b, 0))
        out_struct = jax.ShapeDtypeStruct((outer, 1), jnp.int32)
        scratch = pltpu.VMEM((ob, 1), x.dtype)
        kernel = functools.partial(_argmax_kernel_lane, k_total=k, k_tile=k_tile,
                                   mask_tail=mask_tail, neg_fill=neg_fill)
        x_block_elems = _round_up(ob, _SUBLANE) * _round_up(k_tile, _LANE)
        o_block_elems = _round_up(ob, _SUBLANE) * _LANE

    # Scoped-VMEM request: double-buffered input + int32 iota/candidate temporaries
    # (+ masked copy) + output/scratch, with headroom; clamped to 3/4 of physical VMEM.
    est = (x_block_elems * (3 * itemsize + 8)
           + o_block_elems * (8 + 2 * itemsize)
           + (4 << 20))
    vmem_limit = int(min(max(est, min(32 << 20, vmem_cap // 2)), vmem_cap * 3 // 4))

    out = pl.pallas_call(
        kernel,
        out_shape=out_struct,
        grid_spec=pltpu.PrefetchScalarGridSpec(
            num_scalar_prefetch=0,
            grid=grid,
            in_specs=[in_spec],
            out_specs=out_spec,
            scratch_shapes=[scratch],
        ),
        compiler_params=pltpu.CompilerParams(
            dimension_semantics=("parallel", "parallel", "arbitrary"),
            vmem_limit_bytes=vmem_limit,
        ),
    )(x_v)

    return out.reshape(out_final_shape)


class ArgMax:
    """Mirror of the PyTorch ArgMax module (forward = torch.argmax(x, dim))."""

    def __init__(self, dim=None):
        self.dim = dim

    def __call__(self, x):
        return argmax_forward(x, self.dim)


if __name__ == "__main__":
    key = jax.random.PRNGKey(0)
    B, C, H, W = 2, 4, 16, 16
    x = jax.random.normal(key, (B, C, H, W), jnp.float32)

    # 1) Channel argmax (common segmentation case): K=C on sublanes, H*W=256 on lanes.
    mod = ArgMax(dim=1)
    out = jax.block_until_ready(mod(x))
    ref = jnp.argmax(x, axis=1).astype(jnp.int32)
    assert out.shape == (B, H, W) and out.dtype == jnp.int32
    assert jnp.array_equal(out, ref), "mismatch (dim=1)"

    # 2) A middle reduction axis.
    out2 = jax.block_until_ready(argmax_forward(x, dim=2))
    assert jnp.array_equal(out2, jnp.argmax(x, axis=2)), "mismatch (dim=2)"

    # 3) Last-axis argmax (lane-reduction 2D layout).
    out3 = jax.block_until_ready(argmax_forward(x, dim=-1))
    assert jnp.array_equal(out3, jnp.argmax(x, axis=-1)), "mismatch (dim=-1)"

    # 4) bf16 input (dtype-aware tiling path).
    xb = x.astype(jnp.bfloat16)
    out4 = jax.block_until_ready(argmax_forward(xb, dim=1))
    assert jnp.array_equal(out4, jnp.argmax(xb, axis=1)), "mismatch (bf16, dim=1)"

    # 5) Integer input.
    xi = jax.random.randint(jax.random.PRNGKey(1), (5, 6, 7), 0, 8, jnp.int32)
    out5 = jax.block_until_ready(argmax_forward(xi, dim=0))
    assert jnp.array_equal(out5, jnp.argmax(xi, axis=0)), "mismatch (int32, dim=0)"

    # 6) Split-K + tail masking (forced small block budget), sublane layout.
    xs = jax.random.normal(jax.random.PRNGKey(2), (2, 40, 256), jnp.float32)
    out6 = jax.block_until_ready(argmax_forward(xs, dim=1, block_elems=4096))
    assert jnp.array_equal(out6, jnp.argmax(xs, axis=1)), "mismatch (split-K, dim=1)"

    # 7) Split-K + tail masking, lane (last-axis) layout.
    xl = jax.random.normal(jax.random.PRNGKey(3), (16, 300), jnp.float32)
    out7 = jax.block_until_ready(argmax_forward(xl, dim=-1, block_elems=2048))
    assert jnp.array_equal(out7, jnp.argmax(xl, axis=-1)), "mismatch (split-K, dim=-1)"

    # 8) NaN semantics: first NaN wins (torch/jnp behaviour), including across k-blocks.
    xn = xs.at[1, 37, :].set(jnp.nan).at[0, 5, 3].set(jnp.nan).at[0, 20, 3].set(jnp.nan)
    out8 = jax.block_until_ready(argmax_forward(xn, dim=1, block_elems=4096))
    assert bool(jnp.all(out8[1, :] == 37)), "NaN column should return the NaN index"
    assert int(out8[0, 3]) == 5, "first NaN should win across k-blocks"
    keep = jnp.arange(256) != 3
    assert jnp.array_equal(out8[0][keep], jnp.argmax(xs, axis=1)[0][keep]), \
        "NaN-free columns changed"

    # 9) Integer input with split-K + tail mask (integer fill-value path).
    xi2 = jax.random.randint(jax.random.PRNGKey(4), (2, 20, 256), 0, 8, jnp.int32)
    out9 = jax.block_until_ready(argmax_forward(xi2, dim=1, block_elems=2048))
    assert jnp.array_equal(out9, jnp.argmax(xi2, axis=1)), "mismatch (split-K, int32)"

    print("KERNEL_OK")
</pallas_src>

<mosaic_0001>
module attributes {stable_mosaic.version = 11 : i64} {
  func.func @_argmax_kernel_sublane(%arg0: i32, %arg1: i32, %arg2: i32, %arg3: memref<1x4x256xf32, #tpu.memory_space<vmem>>, %arg4: memref<1x1x256xi32, #tpu.memory_space<vmem>>, %arg5: memref<1x256xf32, #tpu.memory_space<vmem>>) attributes {dimension_semantics = [#tpu.dimension_semantics<parallel>, #tpu.dimension_semantics<parallel>, #tpu.dimension_semantics<arbitrary>], iteration_bounds = array<i64: 2, 1, 1>, scalar_prefetch = 0 : i64, scratch_operands = 1 : i64, tpu.core_type = #tpu.core_type<tc>, window_params = [{transform_indices = @transform_0, window_bounds = array<i64: 1, 4, 256>}, {transform_indices = @transform_1, window_bounds = array<i64: 1, 1, 256>}]} {
    %c0 = arith.constant 0 : index
    %c0_0 = arith.constant 0 : index
    %c0_1 = arith.constant 0 : index
    %0 = vector.load %arg3[%c0, %c0_0, %c0_1] : memref<1x4x256xf32, #tpu.memory_space<vmem>>, vector<1x4x256xf32>
    %1 = vector.shape_cast %0 : vector<1x4x256xf32> to vector<4x256xf32>
    %cst = arith.constant dense<0xFF800000> : vector<256xf32>
    %2 = vector.multi_reduction <maximumf>, %1, %cst [0] : vector<4x256xf32> to vector<256xf32>
    %3 = vector.shape_cast %2 : vector<256xf32> to vector<1x256xf32>
    %4 = vector.broadcast %3 : vector<1x256xf32> to vector<4x256xf32>
    %5 = arith.cmpf oeq, %1, %4 : vector<4x256xf32>
    %6 = arith.cmpf one, %1, %1 : vector<4x256xf32>
    %7 = arith.ori %5, %6 : vector<4x256xi1>
    %8 = tpu.iota {dimensions = array<i32: 0>} : vector<4x256xi32>
    %c4_i32 = arith.constant 4 : i32
    %9 = arith.muli %arg2, %c4_i32 : i32
    %10 = vector.broadcast %9 : i32 to vector<4x256xi32>
    %11 = arith.addi %8, %10 : vector<4x256xi32>
    %c4_i32_2 = arith.constant 4 : i32
    %12 = vector.broadcast %c4_i32_2 : i32 to vector<4x256xi32>
    %13 = arith.select %7, %11, %12 : vector<4x256xi1>, vector<4x256xi32>
    %cst_3 = arith.constant dense<2147483647> : vector<256xi32>
    %14 = vector.multi_reduction <minsi>, %13, %cst_3 [0] : vector<4x256xi32> to vector<256xi32>
    %15 = vector.shape_cast %14 : vector<256xi32> to vector<1x256xi32>
    %c0_4 = arith.constant 0 : index
    %c0_5 = arith.constant 0 : index
    %16 = vector.load %arg5[%c0_4, %c0_5] : memref<1x256xf32, #tpu.memory_space<vmem>>, vector<1x256xf32>
    %c0_6 = arith.constant 0 : index
    %c0_7 = arith.constant 0 : index
    %c0_8 = arith.constant 0 : index
    %17 = vector.load %arg4[%c0_6, %c0_7, %c0_8] : memref<1x1x256xi32, #tpu.memory_space<vmem>>, vector<1x1x256xi32>
    %18 = vector.shape_cast %17 : vector<1x1x256xi32> to vector<1x256xi32>
    %c0_i32 = arith.constant 0 : i32
    %19 = arith.cmpi eq, %arg2, %c0_i32 : i32
    %20 = arith.cmpf ogt, %3, %16 : vector<1x256xf32>
    %21 = vector.broadcast %19 : i1 to vector<1x256xi1>
    %22 = arith.ori %21, %20 : vector<1x256xi1>
    %23 = arith.cmpf one, %3, %3 : vector<1x256xf32>
    %24 = arith.cmpf one, %16, %16 : vector<1x256xf32>
    %cst_9 = arith.constant dense<true> : vector<1x256xi1>
    %25 = arith.xori %24, %cst_9 : vector<1x256xi1>
    %26 = arith.andi %23, %25 : vector<1x256xi1>
    %27 = arith.ori %22, %26 : vector<1x256xi1>
    %28 = arith.select %27, %3, %16 : vector<1x256xi1>, vector<1x256xf32>
    %29 = arith.select %27, %15, %18 : vector<1x256xi1>, vector<1x256xi32>
    %c0_10 = arith.constant 0 : index
    %c0_11 = arith.constant 0 : index
    %30 = vector.load %arg5[%c0_10, %c0_11] : memref<1x256xf32, #tpu.memory_space<vmem>>, vector<1x256xf32>
    tpu.vector_store %arg5[%c0_10, %c0_11], %28 {strides = array<i32>} : memref<1x256xf32, #tpu.memory_space<vmem>>, vector<1x256xf32>,
    %c0_12 = arith.constant 0 : index
    %c0_13 = arith.constant 0 : index
    %c0_14 = arith.constant 0 : index
    %31 = vector.load %arg4[%c0_12, %c0_13, %c0_14] : memref<1x1x256xi32, #tpu.memory_space<vmem>>, vector<1x1x256xi32>
    %32 = vector.shape_cast %31 : vector<1x1x256xi32> to vector<1x256xi32>
    %33 = vector.shape_cast %29 : vector<1x256xi32> to vector<1x1x256xi32>
    tpu.vector_store %arg4[%c0_12, %c0_13, %c0_14], %33 {strides = array<i32>} : memref<1x1x256xi32, #tpu.memory_space<vmem>>, vector<1x1x256xi32>,
    return
  }
  func.func @transform_0(%arg0: i32, %arg1: i32, %arg2: i32) -> (i32, i32, i32) {
    %c0_i32 = arith.constant 0 : i32
    return %arg0, %arg2, %arg1 : i32, i32, i32
  }
  func.func @transform_1(%arg0: i32, %arg1: i32, %arg2: i32) -> (i32, i32, i32) {
    %c0_i32 = arith.constant 0 : i32
    %c0_i32_0 = arith.constant 0 : i32
    return %arg0, %c0_i32, %arg1 : i32, i32, i32
  }
}

</mosaic_0001>

<bundles_post_ra>
// kernel: tpu_custom_call.1
= control target key start
LH: loop header
LB: loop body
LE: loop exit
PB: predicated region body
PF: predicated region fallthrough
CT: control target
= control target key end

     0   :  { %6 = vsyncpa [#allocation4], 0  ;;  %s814_s0 = inlined_call_operand.hbm [shape: f32[2,4,256], index: 0, kind: input, shape index: {}]   ;;  %s815_s1 = inlined_call_operand.hbm [shape: s32[2,1,256], index: 1, kind: output, shape index: {}]  }
   0x1   :  { %8 = vsyncpa [#allocation4 + $0x1], 0 }
   0x2   :  { %9 = vsyncpa [#allocation5], 0 }
   0x3   :  { %11 = vsyncpa [#allocation5 + $0x1], 0  ;;  %s631_s6 = smov 0   ;;  %s633_s7 = smov 0  }
   0x4   :  { %s635_s8 = smov 0   ;;  %s637_s9 = smov 0  }
   0x5   :  { %s639_s10 = smov 0   ;;  %s641_s11 = smov 0  }
   0x6 LB: > { %s421_s12 = sadd.s32 4294967295, %s615_s11   ;;  %s422_s13 = sadd.s32 4294967294, %s615_s11   ;;  %s615_s11 = sphi %s641_s11, %s17_s11   ;;  %s611_s10 = sphi %s639_s10, %s833_s10   ;;  %s607_s9 = sphi %s637_s9, %s832_s9   ;;  %s603_s8 = sphi %s635_s8, %s831_s8   ;;  %s599_s7 = sphi %s633_s7, %s830_s7   ;;  %s595_s6 = sphi %s631_s6, %s829_s6  }
   0x7   : > { %s36_s14 = sadd.s32 1, %s611_s10  ;;  %s47_s15 = sadd.s32 1, %s603_s8 }
   0x8   : > { %p38_p0 = scmp.ge.s32.totalorder %s36_s14, 2  ;;  %p54_p1 = scmp.ne.s32.totalorder %s603_s8, %s599_s7 }
   0x9   : > { %p55_p2 = scmp.eq.s32.totalorder %s615_s11, 0  ;;  %p60_p3 = scmp.ne.s32.totalorder %s599_s7, %s595_s6 }
   0xa   : > { %s835_s14 = smov (%p38_p0, %s36_s14), 0  ;;  %p61_p5 = scmp.eq.s32.totalorder %s421_s12, 0 }
   0xb   : > { %p672_p4 = por %p55_p2, %p54_p1  ;;  %s40_s17 = ssub.s32 %s611_s10, %s835_s14 }
   0xc   : > { %p86_p6 = scmp.eq.s32.totalorder %s421_s12, 1  ;;  %p45_p7 = scmp.eq.s32.totalorder %s40_s17, 0 }
   0xd   : > { %p678_p8 = por %p61_p5, %p60_p3  ;;  %p92_p10 = scmp.eq.s32.totalorder %s422_s13, 1 }
   0xe   : > { %p682_p9 = por %p86_p6, %p54_p1  ;;  %p450_p13 = scmp.lt.s32.totalorder %s615_s11, 2 }
   0xf   : > { %s687_s20 = scalar_select %p45_p7, %s603_s8, %s47_s15  }
  0x10   : > { %s819_s19 = scalar_select %p682_p9, 1, 0 }
  0x11   : > { %p689_p11 = por %p92_p10, %p60_p3  ;;  %s112_s22 = sand.u32 1, %s603_s8  }
  0x12   : > { %s425_s23 = sshll.u32 %s112_s22, 3  ;;  %s436_s24 = sshll.u32 %s611_s10, 7 }
  0x13   : > { %s820_s21 = scalar_select %p689_p11, 1, 0 }
  0x14   : > { %s700_s27 = scalar_lea.hbm %s814_s0, %s436_s24  ;;  %s116_s28 = scalar_lea.vmem [#allocation3], %s425_s23 }
  0x15   : > { %s128_s29 = sshll.u32 %s116_s28, 4  ;;  %p706_p0 = pnand %p450_p13, %p672_p4  ;;  %s702_s29 = int_to_ptr.vmem [resolvable:$true] %s128_s29 }
  0x16   : > { %s113_s2 = scalar_lea.sflag [#allocation4], %s112_s22  ;;  %s503_s3 = scalar_lea.hbm %s700_s27, 128 }
  0x17   : > { %p504_p3 = scmp.ne.s32.totalorder %s700_s27, %s503_s3  ;;  %p505_p5 = pneg %p706_p0 }
  0x18   : > { %s508_s12 = scalar_lea.hbm %s814_s0, 256  ;;  %p509_p4 = scmp.lt.u32.totalorder %s700_s27, %s814_s0 }
  0x19   : > { %p506_p6 = pnand %p505_p5, %p504_p3  ;;  %p510_p10 = scmp.lt.u32.totalorder %s508_s12, %s503_s3 }
  0x1a   : > { %p512_p12 = scmp.lt.u32.totalorder %s503_s3, %s700_s27 }
  0x1b   : > { %p507_p7 = pneg %p506_p6  ;;  %p511_p13 = por %p510_p10, %p509_p4 }
  0x1d   : > { %p513_p1 = por %p512_p12, %p511_p13 }
  0x1f   : > { %p514_p2 = pnand %p513_p1, %p507_p7 }
  0x21   : > { %517 = shalt.err (!%p514_p2)
}
  0x22   : > { %s518_s16 = scalar_lea.vmem %s702_s29, 128  ;;  %s617_s17 = smov [#allocation3]  }
  0x23   : > { %p519_p3 = scmp.ne.s32.totalorder %s702_s29, %s518_s16  ;;  %s523_s22 = sshll.u32 %s617_s17, 4  ;;  %s524_s22 = int_to_ptr.vmem [resolvable:$false] %s523_s22 }
  0x24   : > { %s525_s23 = scalar_lea.vmem %s524_s22, 256  ;;  %p526_p9 = scmp.lt.s32.totalorder %s702_s29, %s524_s22 }
  0x25   : > { %p521_p6 = pnand %p519_p3, %p505_p5  ;;  %p527_p4 = scmp.lt.s32.totalorder %s525_s23, %s518_s16 }
  0x27   : > { %p522_p11 = pneg %p521_p6  ;;  %p528_p10 = por %p527_p4, %p526_p9 }
  0x29   : > { %p529_p12 = pnand %p528_p10, %p522_p11 }
  0x2b   : > { %532 = shalt.err (!%p529_p12)
}
  0x2c   : > { %445 = dma.hbm_to_vmem [thread:$0]  (!%p706_p0), %s700_s27, 128, %s702_s29, %s113_s2  }
  0x2d   : > { %p822_p1 = scmp.lt.s32.totalorder %s615_s11, 3  ;;  %p823_p2 = scmp.ge.s32.totalorder %s615_s11, 1 }
  0x2f   : > { %p134_p5 = pnand %p823_p2, %p822_p1 }
  0x30   : > { %s742_s24 = sand.u32 (!%p134_p5), 1, %s599_s7  }
  0x31   : > { %137 = sbr.rel (%p134_p5) target bundleno = 113 (0x71), region = 24  ;;  %s429_s25 = sshll.u32 (!%p134_p5), %s742_s24, 3 }
  0x32   : > { %s140_s26 = scalar_lea.sflag (!%p134_p5), [#allocation4], %s742_s24  ;;  %s143_s28 = scalar_lea.vmem (!%p134_p5), [#allocation3], %s429_s25 }
  0x38   : > { %586 = dma.done.wait (%p678_p8), %s140_s26, 128  }
  0x39   : > { %588 = vsyncadd (%p678_p8), %s140_s26, 4294967168  ;;  %vm168_vm0 = vcmask 1043456   ;;  %v164_v0 = vld [vmem:[%s143_s28] sm:$0xff]  ;;  %v190_v7 = vlaneseq  ;;  %v618_v8 = vmov 839922192   ;;  %s430_s18 = sshll.u32 %s742_s24, 1 }
  0x3a   : > { %v166_v1 = vcombine.high %v164_v0, %v164_v0  ;;  %v169_v2 = vsel %vm168_vm0, %v164_v0, -inf  ;;  %v196_v9 = vunpack.c.l.s4 %v618_v8  ;;  %v619_v12 = vmov 1966171168   ;;  %s161_s27 = scalar_lea.vmem [#allocation6], %s430_s18  ;;  %s437_s30 = sshll.u32 %s607_s9, 5 }
  0x3b   : > { %v170_v3 = vrot.slane %v169_v2, 4  ;;  %v280_v13 = vunpack.c.l.s4 %v619_v12  ;;  %v191_v16 = vshrl.u32 %v190_v7, 7  ;;  %vm188_vm1 = vcmp.ne.f32.partialorder %v164_v0, %v164_v0  ;;  %s332_s29 = sshll.u32 %s161_s27, 4  ;;  %s765_s4 = scalar_lea.hbm %s815_s1, %s437_s30  ;;  %s760_s29 = int_to_ptr.vmem [resolvable:$true] %s332_s29 }
  0x3c   : > { %v176_v4 = vsel %vm168_vm0, %v166_v1, -inf  ;;  %v197_v17 = vunpack.c.0.s8 %v196_v9  ;;  %vm752_vm4 = vcmp.lt.s32.totalorder %v190_v7, 256  ;;  %s316_s5 = scalar_lea.sflag [#allocation5], %s742_s24  ;;  %s533_s12 = scalar_lea.vmem %s760_s29, 32 }
  0x3d   : > { %v171_v5 = vmax.f32 %v169_v2, %v170_v3  ;;  %v177_v6 = vrot.slane %v176_v4, 4  ;;  %v281_v20 = vunpack.c.0.s8 %v280_v13  ;;  %p534_p8 = scmp.ne.s32.totalorder %s760_s29, %s533_s12  ;;  %p826_p9 = scmp.ne.s32.totalorder %s819_s19, 0 }
  0x3e   : > { %v200_v23 = vsub.s32 %v197_v17, %v191_v16  ;;  %s620_s9 = smov [#allocation6]  }
  0x3f   : > { %v172_v10 = vrot.slane %v171_v5, 2  ;;  %v178_v11 = vmax.f32 %v176_v4, %v177_v6  ;;  %v284_v25 = vsub.s32 %v281_v20, %v191_v16  ;;  %p535_p11 = pnand %p534_p8, %p826_p9  ;;  %s537_s13 = sshll.u32 %s620_s9, 4  ;;  %s538_s13 = int_to_ptr.vmem [resolvable:$false] %s537_s13 }
  0x40   : > { %v201_v27 = vrot.slane %v191_v16, %v200_v23  ;;  %s539_s15 = scalar_lea.vmem %s538_s13, 64  ;;  %p540_p7 = scmp.lt.s32.totalorder %s760_s29, %s538_s13 }
  0x41   : > { %v173_v14 = vmax.f32 %v171_v5, %v172_v10  ;;  %v179_v15 = vrot.slane %v178_v11, 2  ;;  %p536_p0 = pneg %p535_p11  ;;  %p541_p13 = scmp.lt.s32.totalorder %s539_s15, %s533_s12 }
  0x43   : > { %v174_v18 = vrot.slane %v173_v14, 1  ;;  %v180_v19 = vmax.f32 %v178_v11, %v179_v15  ;;  %p542_p3 = por %p541_p13, %p540_p7 }
  0x45   : > { %v175_v21 = vmax.f32 %v173_v14, %v174_v18  ;;  %v181_v22 = vrot.slane %v180_v19, 1  ;;  %p543_p6 = pnand %p542_p3, %p536_p0 }
  0x47   : > { %v182_v24 = vmax.f32 %v180_v19, %v181_v22 }
  0x49   : > { %v185_v26 = vcombine.low %v175_v21, %v182_v24 }
  0x4b   : > { %vm187_vm2 = vcmp.eq.f32.partialorder %v164_v0, %v185_v26 }
  0x4c   : > { %vm189_vm3 = vmor %vm187_vm2, %vm188_vm1 }
  0x4d   : > { %v202_v29 = vsel %vm189_vm3, %v201_v27, 4 }
  0x4e   : > { %v203_v30 = vcombine.high %v202_v29, %v202_v29  ;;  %v204_v31 = vsel %vm168_vm0, %v202_v29, 2147483647 }
  0x4f   : > { %v205_v32 = vrot.slane %v204_v31, 4 }
  0x50   : > { %v214_v33 = vsel %vm168_vm0, %v203_v30, 2147483647 }
  0x51   : > { %vm206_vm5 = vcmp.lt.s32.totalorder %v204_v31, %v205_v32  ;;  %v215_v34 = vrot.slane %v214_v33, 4 }
  0x52   : > { %v207_v35 = vsel %vm206_vm5, %v204_v31, %v205_v32 }
  0x53   : > { %v208_v36 = vrot.slane %v207_v35, 2  ;;  %vm216_vm6 = vcmp.lt.s32.totalorder %v214_v33, %v215_v34 }
  0x54   : > { %v217_v37 = vsel %vm216_vm6, %v214_v33, %v215_v34 }
  0x55   : > { %vm209_vm7 = vcmp.lt.s32.totalorder %v207_v35, %v208_v36  ;;  %v218_v38 = vrot.slane %v217_v37, 2 }
  0x56   : > { %v210_v39 = vsel %vm209_vm7, %v207_v35, %v208_v36 }
  0x57   : > { %v211_v40 = vrot.slane %v210_v39, 1  ;;  %vm219_vm8 = vcmp.lt.s32.totalorder %v217_v37, %v218_v38 }
  0x58   : > { %v220_v41 = vsel %vm219_vm8, %v217_v37, %v218_v38 }
  0x59   : > { %vm212_vm9 = vcmp.lt.s32.totalorder %v210_v39, %v211_v40  ;;  %v221_v42 = vrot.slane %v220_v41, 1 }
  0x5a   : > { %v213_v43 = vsel %vm212_vm9, %v210_v39, %v211_v40 }
  0x5b   : > { %vm222_vm10 = vcmp.lt.s32.totalorder %v220_v41, %v221_v42 }
  0x5c   : > { %v223_v44 = vsel %vm222_vm10, %v220_v41, %v221_v42 }
  0x5d   : > { %v299_v45 = vcombine.low %v213_v43, %v223_v44 }
  0x5f   : > { %v306_v46 = vrot.slane %v299_v45, %v284_v25 }
  0x61   : > { %v313_v47 = vrot.slane %v306_v46, %v284_v25 }
  0x63   : > { %314 = vst.msk [vmem:[%s161_s27] sm:$0x3] %vm752_vm4, %v313_v47 }
  0x64   : > { %546 = shalt.err (!%p543_p6)
}
  0x65   : > { %s547_s16 = scalar_lea.hbm %s765_s4, 32  ;;  %s551_s23 = scalar_lea.hbm %s815_s1, 64 }
  0x66   : > { %p548_p4 = scmp.ne.s32.totalorder %s765_s4, %s547_s16  ;;  %p552_p1 = scmp.lt.u32.totalorder %s765_s4, %s815_s1 }
  0x67   : > { %p553_p2 = scmp.lt.u32.totalorder %s551_s23, %s547_s16  ;;  %p555_p8 = scmp.lt.u32.totalorder %s547_s16, %s765_s4 }
  0x68   : > { %p549_p10 = pnand %p548_p4, %p826_p9 }
  0x69   : > { %p554_p5 = por %p553_p2, %p552_p1 }
  0x6a   : > { %p550_p12 = pneg %p549_p10 }
  0x6b   : > { %p556_p11 = por %p555_p8, %p554_p5 }
  0x6d   : > { %p557_p0 = pnand %p556_p11, %p550_p12 }
  0x6f   : > { %560 = shalt.err (!%p557_p0)
}
  0x70   : > { %440 = dma.vmem_to_hbm [thread:$0]  (%p826_p9), %s760_s29, 32, %s765_s4, %s316_s5  }
  0x71 PF: > { %s344_s26 = sand.u32 1, %s595_s6   ;;  %p827_p7 = scmp.ne.s32.totalorder %s820_s21, 0 }
  0x72   : > { %p828_p13 = scmp.ge.s32.totalorder %s615_s11, 2  ;;  %s345_s28 = scalar_lea.sflag [#allocation5], %s344_s26 }
  0x74   : > { %p447_p3 = pnand %p828_p13, %p827_p7 }
  0x76   : > { %590 = dma.done.wait (!%p447_p3), %s345_s28, 32  }
  0x77   : > { %592 = vsyncadd (!%p447_p3), %s345_s28, 4294967264  ;;  %s17_s11 = sadd.s32 1, %s615_s11   ;;  %s829_s6 = smov %s599_s7 }
  0x78   : > { %p14_p6 = scmp.ge.s32.totalorder %s17_s11, 4   ;;  %s830_s7 = smov %s603_s8 }
  0x79   : > { %s831_s8 = smov %s687_s20  ;;  %s832_s9 = smov %s611_s10 }
  0x7a   : > { %s833_s10 = smov %s835_s14  ;;  %16 = sbr.rel (!%p14_p6) target bundleno = 6 (0x6), region = 69 }
  0x81   :  { %350 = vsyncpa [#allocation4], 1 }
  0x82   :  { %352 = vsyncpa [#allocation4 + $0x1], 1 }
  0x83   :  { %353 = vsyncpa [#allocation5], 1 }
  0x84   :  { %355 = vsyncpa [#allocation5 + $0x1], 1 }

</bundles_post_ra>
